<compile_context>
chip_gen: v7x
topology: tpu7x:2x2x1
jax: 0.10.0
libtpu: 0.0.40
codegen_flags: <defaults>
</compile_context>

<pallas_src>
import jax
import jax.numpy as jnp
from jax.experimental import pallas as pl
from jax.experimental.pallas import tpu as pltpu


def _projection_head_kernel(x_ref, w1_ref, b1_ref, w2_ref, b2_ref, o_ref, acc_ref):
    k = pl.program_id(1)
    nk = pl.num_programs(1)

    # h_k = relu(x @ W1[:, k_tile] + b1[k_tile])   (bf16 matmul, f32 bias/ReLU)
    h = jnp.dot(x_ref[...], w1_ref[...], preferred_element_type=jnp.float32)
    h = jnp.maximum(h + b1_ref[...], 0.0)

    # partial_k = h_k @ W2[k_tile, :]
    partial = jnp.dot(h.astype(w2_ref.dtype), w2_ref[...],
                      preferred_element_type=jnp.float32)

    @pl.when(k == 0)
    def _first():
        acc_ref[...] = partial          # write directly: no zero-init pass

    @pl.when(k > 0)
    def _rest():
        acc_ref[...] += partial

    @pl.when(k == nk - 1)
    def _finalize():
        o_ref[...] = (acc_ref[...] + b2_ref[...]).astype(o_ref.dtype)


def _round_up(x, m):
    return (x + m - 1) // m * m


def projection_head(x, w1, b1, w2, b2, *, tile_b=None, tile_k=None,
                    matmul_dtype=jnp.bfloat16):
    """x: [B, D_in]; w1: [D_in, D_hid]; b1: [D_hid]; w2: [D_hid, D_out]; b2: [D_out]."""
    B, D_in = x.shape
    D_hid = w1.shape[1]
    D_out = w2.shape[1]
    out_dtype = x.dtype

    # ---- batch tile: 256 rows (MXU-friendly, pipelines + megacore shards);
    #      for tiny batches use the sublane-rounded batch itself.
    if tile_b is None:
        tile_b = 256 if B >= 256 else _round_up(B, 8)
    B_pad = _round_up(B, tile_b)

    # ---- hidden/contraction tile: largest 128-multiple divisor of D_hid, else full.
    if tile_k is None:
        tile_k = D_hid
        for cand in (512, 256, 128):
            if D_hid % cand == 0:
                tile_k = cand
                break

    # ---- dtypes: bf16 matmul operands (half the weight-DMA bytes, bf16 MXU peak);
    #      biases added in f32 inside the kernel.
    if matmul_dtype is not None:
        x_in = x.astype(matmul_dtype)
        w1_in = w1.astype(matmul_dtype)
        w2_in = w2.astype(matmul_dtype)
    else:
        x_in, w1_in, w2_in = x, w1, w2
    b1_in = b1.reshape(1, D_hid).astype(jnp.float32)
    b2_in = b2.reshape(1, D_out).astype(jnp.float32)

    if B_pad != B:
        x_in = jnp.pad(x_in, ((0, B_pad - B), (0, 0)))

    grid = (B_pad // tile_b, D_hid // tile_k)

    # ---- explicit VMEM budget (double-buffered tiles + resident f32 accumulator).
    itm = jnp.dtype(x_in.dtype).itemsize
    est = 2 * (tile_b * D_in * itm                                   # x tile
               + D_in * tile_k * itm                                 # W1 column block
               + tile_k * 4                                          # b1 slice
               + tile_k * D_out * itm                                # W2 row block
               + D_out * 4                                           # b2
               + tile_b * D_out * jnp.dtype(out_dtype).itemsize)     # out tile
    est += tile_b * D_out * 4                                        # accumulator
    vmem_limit = int(min(max(2 * est, 32 * 2**20), 64 * 2**20))

    out = pl.pallas_call(
        _projection_head_kernel,
        out_shape=jax.ShapeDtypeStruct((B_pad, D_out), out_dtype),
        grid_spec=pltpu.PrefetchScalarGridSpec(
            num_scalar_prefetch=0,
            grid=grid,
            in_specs=[
                pl.BlockSpec((tile_b, D_in), lambda i, k: (i, 0)),    # x rows
                pl.BlockSpec((D_in, tile_k), lambda i, k: (0, k)),    # W1 columns
                pl.BlockSpec((1, tile_k), lambda i, k: (0, k)),       # b1 slice
                pl.BlockSpec((tile_k, D_out), lambda i, k: (k, 0)),   # W2 rows
                pl.BlockSpec((1, D_out), lambda i, k: (0, 0)),        # b2
            ],
            out_specs=pl.BlockSpec((tile_b, D_out), lambda i, k: (i, 0)),
            scratch_shapes=[pltpu.VMEM((tile_b, D_out), jnp.float32)],
        ),
        compiler_params=pltpu.CompilerParams(
            dimension_semantics=("parallel", "arbitrary"),
            vmem_limit_bytes=vmem_limit),
    )(x_in, w1_in, b1_in, w2_in, b2_in)

    return out[:B] if B_pad != B else out


if __name__ == "__main__":
    input_dim = 128
    output_dim = 128
    batch = 8

    key = jax.random.PRNGKey(0)
    k_x, k_w1, k_b1, k_w2, k_b2 = jax.random.split(key, 5)

    # Deterministic parameter init (nn.Linear-like uniform scale).
    bound = 1.0 / (input_dim ** 0.5)
    x = jax.random.normal(k_x, (batch, input_dim), dtype=jnp.float32)
    w1 = jax.random.uniform(k_w1, (input_dim, input_dim), jnp.float32, -bound, bound)
    b1 = jax.random.uniform(k_b1, (input_dim,), jnp.float32, -bound, bound)
    w2 = jax.random.uniform(k_w2, (input_dim, output_dim), jnp.float32, -bound, bound)
    b2 = jax.random.uniform(k_b2, (output_dim,), jnp.float32, -bound, bound)

    out = projection_head(x, w1, b1, w2, b2)
    out = jax.block_until_ready(out)
    assert out.shape == (batch, output_dim)

    # Matched-precision reference (bf16 matmul operands, f32 bias/relu/accumulate).
    xb, w1b, w2b = (a.astype(jnp.bfloat16) for a in (x, w1, w2))
    h_ref = jnp.maximum(
        jnp.dot(xb, w1b, preferred_element_type=jnp.float32) + b1[None, :], 0.0)
    ref_bf16 = jnp.dot(h_ref.astype(jnp.bfloat16), w2b,
                       preferred_element_type=jnp.float32) + b2[None, :]
    assert jnp.allclose(out, ref_bf16, atol=2e-3, rtol=2e-3)

    # Full-f32 reference (loose tolerance: matmul operands were bf16).
    ref_f32 = jnp.maximum(x @ w1 + b1[None, :], 0.0) @ w2 + b2[None, :]
    assert jnp.allclose(out, ref_f32, atol=5e-2, rtol=5e-2)

    print("KERNEL_OK")
</pallas_src>

<mosaic_0001>
module attributes {stable_mosaic.version = 11 : i64} {
  func.func @_projection_head_kernel(%arg0: i32, %arg1: i32, %arg2: memref<8x128xbf16, #tpu.memory_space<vmem>>, %arg3: memref<128x128xbf16, #tpu.memory_space<vmem>>, %arg4: memref<1x128xf32, #tpu.memory_space<vmem>>, %arg5: memref<128x128xbf16, #tpu.memory_space<vmem>>, %arg6: memref<1x128xf32, #tpu.memory_space<vmem>>, %arg7: memref<8x128xf32, #tpu.memory_space<vmem>>, %arg8: memref<8x128xf32, #tpu.memory_space<vmem>>) attributes {dimension_semantics = [#tpu.dimension_semantics<parallel>, #tpu.dimension_semantics<arbitrary>], iteration_bounds = array<i64: 1, 1>, scalar_prefetch = 0 : i64, scratch_operands = 1 : i64, tpu.core_type = #tpu.core_type<tc>, window_params = [{transform_indices = @transform_0, window_bounds = array<i64: 8, 128>}, {transform_indices = @transform_1, window_bounds = array<i64: 128, 128>}, {transform_indices = @transform_2, window_bounds = array<i64: 1, 128>}, {transform_indices = @transform_3, window_bounds = array<i64: 128, 128>}, {pipeline_mode = #tpu.pipeline_mode<synchronous>, transform_indices = @transform_4, window_bounds = array<i64: 1, 128>}, {transform_indices = @transform_5, window_bounds = array<i64: 8, 128>}]} {
    %c0 = arith.constant 0 : index
    %c0_0 = arith.constant 0 : index
    %0 = vector.load %arg2[%c0, %c0_0] : memref<8x128xbf16, #tpu.memory_space<vmem>>, vector<8x128xbf16>
    %c0_1 = arith.constant 0 : index
    %c0_2 = arith.constant 0 : index
    %1 = vector.load %arg3[%c0_1, %c0_2] : memref<128x128xbf16, #tpu.memory_space<vmem>>, vector<128x128xbf16>
    %cst = arith.constant dense<0.000000e+00> : vector<8x128xf32>
    %2 = tpu.matmul %0, %1, %cst {dimension_numbers = #tpu.dot_dimension_numbers<[1], [0], [0], [1], [0, 0, 1, 1], [], []>} : vector<8x128xbf16>, vector<128x128xbf16>, vector<8x128xf32> -> vector<8x128xf32>
    %c0_3 = arith.constant 0 : index
    %c0_4 = arith.constant 0 : index
    %3 = vector.load %arg4[%c0_3, %c0_4] : memref<1x128xf32, #tpu.memory_space<vmem>>, vector<1x128xf32>
    %4 = vector.broadcast %3 : vector<1x128xf32> to vector<8x128xf32>
    %5 = arith.addf %2, %4 : vector<8x128xf32>
    %cst_5 = arith.constant 0.000000e+00 : f32
    %6 = vector.broadcast %cst_5 : f32 to vector<8x128xf32>
    %7 = arith.maximumf %5, %6 : vector<8x128xf32>
    %8 = arith.truncf %7 : vector<8x128xf32> to vector<8x128xbf16>
    %c0_6 = arith.constant 0 : index
    %c0_7 = arith.constant 0 : index
    %9 = vector.load %arg5[%c0_6, %c0_7] : memref<128x128xbf16, #tpu.memory_space<vmem>>, vector<128x128xbf16>
    %cst_8 = arith.constant dense<0.000000e+00> : vector<8x128xf32>
    %10 = tpu.matmul %8, %9, %cst_8 {dimension_numbers = #tpu.dot_dimension_numbers<[1], [0], [0], [1], [0, 0, 1, 1], [], []>} : vector<8x128xbf16>, vector<128x128xbf16>, vector<8x128xf32> -> vector<8x128xf32>
    %c0_i32 = arith.constant 0 : i32
    %11 = arith.cmpi eq, %arg1, %c0_i32 : i32
    %12 = arith.extui %11 : i1 to i32
    %c0_i32_9 = arith.constant 0 : i32
    %13 = arith.cmpi ne, %12, %c0_i32_9 : i32
    scf.if %13 {
      %c0_14 = arith.constant 0 : index
      %c0_15 = arith.constant 0 : index
      %20 = vector.load %arg8[%c0_14, %c0_15] : memref<8x128xf32, #tpu.memory_space<vmem>>, vector<8x128xf32>
      tpu.vector_store %arg8[%c0_14, %c0_15], %10 {strides = array<i32>} : memref<8x128xf32, #tpu.memory_space<vmem>>, vector<8x128xf32>,
    } else {
    }
    %c0_i32_10 = arith.constant 0 : i32
    %14 = arith.cmpi sgt, %arg1, %c0_i32_10 : i32
    %15 = arith.extui %14 : i1 to i32
    %c0_i32_11 = arith.constant 0 : i32
    %16 = arith.cmpi ne, %15, %c0_i32_11 : i32
    scf.if %16 {
      %c0_14 = arith.constant 0 : index
      %c0_15 = arith.constant 0 : index
      %20 = vector.load %arg8[%c0_14, %c0_15] : memref<8x128xf32, #tpu.memory_space<vmem>>, vector<8x128xf32>
      %21 = arith.addf %20, %10 : vector<8x128xf32>
      %c0_16 = arith.constant 0 : index
      %c0_17 = arith.constant 0 : index
      %22 = vector.load %arg8[%c0_16, %c0_17] : memref<8x128xf32, #tpu.memory_space<vmem>>, vector<8x128xf32>
      tpu.vector_store %arg8[%c0_16, %c0_17], %21 {strides = array<i32>} : memref<8x128xf32, #tpu.memory_space<vmem>>, vector<8x128xf32>,
    } else {
    }
    %c0_i32_12 = arith.constant 0 : i32
    %17 = arith.cmpi eq, %arg1, %c0_i32_12 : i32
    %18 = arith.extui %17 : i1 to i32
    %c0_i32_13 = arith.constant 0 : i32
    %19 = arith.cmpi ne, %18, %c0_i32_13 : i32
    scf.if %19 {
      %c0_14 = arith.constant 0 : index
      %c0_15 = arith.constant 0 : index
      %20 = vector.load %arg8[%c0_14, %c0_15] : memref<8x128xf32, #tpu.memory_space<vmem>>, vector<8x128xf32>
      %c0_16 = arith.constant 0 : index
      %c0_17 = arith.constant 0 : index
      %21 = vector.load %arg6[%c0_16, %c0_17] : memref<1x128xf32, #tpu.memory_space<vmem>>, vector<1x128xf32>
      %22 = vector.broadcast %21 : vector<1x128xf32> to vector<8x128xf32>
      %23 = arith.addf %20, %22 : vector<8x128xf32>
      %c0_18 = arith.constant 0 : index
      %c0_19 = arith.constant 0 : index
      %24 = vector.load %arg7[%c0_18, %c0_19] : memref<8x128xf32, #tpu.memory_space<vmem>>, vector<8x128xf32>
      tpu.vector_store %arg7[%c0_18, %c0_19], %23 {strides = array<i32>} : memref<8x128xf32, #tpu.memory_space<vmem>>, vector<8x128xf32>,
    } else {
    }
    return
  }
  func.func @transform_0(%arg0: i32, %arg1: i32) -> (i32, i32) {
    %c0_i32 = arith.constant 0 : i32
    %c0_i32_0 = arith.constant 0 : i32
    return %arg0, %c0_i32 : i32, i32
  }
  func.func @transform_1(%arg0: i32, %arg1: i32) -> (i32, i32) {
    %c0_i32 = arith.constant 0 : i32
    %c0_i32_0 = arith.constant 0 : i32
    return %c0_i32, %arg1 : i32, i32
  }
  func.func @transform_2(%arg0: i32, %arg1: i32) -> (i32, i32) {
    %c0_i32 = arith.constant 0 : i32
    %c0_i32_0 = arith.constant 0 : i32
    return %c0_i32, %arg1 : i32, i32
  }
  func.func @transform_3(%arg0: i32, %arg1: i32) -> (i32, i32) {
    %c0_i32 = arith.constant 0 : i32
    %c0_i32_0 = arith.constant 0 : i32
    return %arg1, %c0_i32 : i32, i32
  }
  func.func @transform_4(%arg0: i32, %arg1: i32) -> (i32, i32) {
    %c0_i32 = arith.constant 0 : i32
    %c0_i32_0 = arith.constant 0 : i32
    %c0_i32_1 = arith.constant 0 : i32
    return %c0_i32, %c0_i32_0 : i32, i32
  }
  func.func @transform_5(%arg0: i32, %arg1: i32) -> (i32, i32) {
    %c0_i32 = arith.constant 0 : i32
    %c0_i32_0 = arith.constant 0 : i32
    return %arg0, %c0_i32 : i32, i32
  }
}

</mosaic_0001>

<bundles_post_ra>
// kernel: tpu_custom_call.1
= control target key start
LH: loop header
LB: loop body
LE: loop exit
PB: predicated region body
PF: predicated region fallthrough
CT: control target
= control target key end

     0   :  { %10 = vsyncpa [#allocation4], 0  ;;  %s612_s0 = inlined_call_operand.hbm [shape: bf16[8,128], index: 0, kind: input, shape index: {}]   ;;  %s613_s1 = inlined_call_operand.hbm [shape: bf16[128,128], index: 1, kind: input, shape index: {}]   ;;  %s614_s2 = inlined_call_operand.vmem [shape: f32[1,128], index: 2, kind: input, shape index: {}]   ;;  %s615_s3 = inlined_call_operand.hbm [shape: bf16[128,128], index: 3, kind: input, shape index: {}]   ;;  %s616_s4 = inlined_call_operand.vmem [shape: f32[1,128], index: 4, kind: input, shape index: {}]   ;;  %s617_s5 = inlined_call_operand.hbm [shape: f32[8,128], index: 5, kind: output, shape index: {}]  }
   0x1   :  { %11 = vsyncpa [#allocation7], 0 }
   0x2   :  { %12 = vsyncpa [#allocation5], 0  ;;  %s514_s18 = smov [#allocation6]   ;;  %s420_s22 = scalar_lea.hbm %s613_s1, 1024 }
   0x3   :  { %s28_s19 = sshll.u32 %s514_s18, 4  ;;  %p421_p0 = scmp.ne.s32.totalorder %s613_s1, %s420_s22  ;;  %s29_s19 = int_to_ptr.vmem [resolvable:$true] %s28_s19 }
   0x4   :  { %p424_p1 = scmp.lt.u32.totalorder %s420_s22, %s613_s1 }
   0x6   :  { %p426_p2 = pnand %p424_p1, %p421_p0 }
   0x8   :  { %429 = shalt.err (!%p426_p2)
}
   0x9   :  { %s430_s27 = scalar_lea.vmem %s29_s19, 1024  ;;  %p435_p4 = scmp.lt.s32.totalorder %s29_s19, %s29_s19 }
   0xa   :  { %p431_p3 = scmp.ne.s32.totalorder %s29_s19, %s430_s27  ;;  %p436_p5 = scmp.lt.s32.totalorder %s430_s27, %s430_s27 }
   0xc   :  { %p437_p6 = por %p436_p5, %p435_p4 }
   0xe   :  { %p438_p7 = pnand %p437_p6, %p431_p3 }
  0x10   :  { %441 = shalt.err (!%p438_p7)
}
  0x11   :  { %s515_s28 = smov 64   ;;  %s516_s29 = smov 4  }
  0x12   :  { %34 = dma.hbm_to_vmem [thread:$0]  %s613_s1, 1024, %s29_s19, [#allocation7], %s515_s28, %s515_s28, %s516_s29  }
  0x13   :  { %s517_s7 = smov [#allocation3]   ;;  %s518_s9 = smov [#allocation8]  }
  0x14   :  { %s19_s8 = sshll.u32 %s517_s7, 4  ;;  %s42_s10 = sshll.u32 %s518_s9, 4  ;;  %s20_s8 = int_to_ptr.vmem [resolvable:$true] %s19_s8  ;;  %s43_s10 = int_to_ptr.vmem [resolvable:$true] %s42_s10 }
  0x15   :  { %s442_s13 = scalar_lea.hbm %s612_s0, 64 }
  0x16   :  { %p443_p8 = scmp.ne.s32.totalorder %s612_s0, %s442_s13  ;;  %p446_p9 = scmp.lt.u32.totalorder %s442_s13, %s612_s0 }
  0x18   :  { %p448_p10 = pnand %p446_p9, %p443_p8 }
  0x1a   :  { %451 = shalt.err (!%p448_p10)
}
  0x1b   :  { %s452_s1 = scalar_lea.vmem %s20_s8, 64  ;;  %p457_p12 = scmp.lt.s32.totalorder %s20_s8, %s20_s8 }
  0x1c   :  { %p453_p11 = scmp.ne.s32.totalorder %s20_s8, %s452_s1  ;;  %p458_p13 = scmp.lt.s32.totalorder %s452_s1, %s452_s1 }
  0x1e   :  { %p459_p0 = por %p458_p13, %p457_p12 }
  0x20   :  { %p460_p1 = pnand %p459_p0, %p453_p11 }
  0x22   :  { %463 = shalt.err (!%p460_p1)
}
  0x23   :  { %22 = dma.hbm_to_vmem [thread:$0]  %s612_s0, 64, %s20_s8, [#allocation4]  }
  0x24   :  { %s464_s22 = scalar_lea.hbm %s615_s3, 1024 }
  0x25   :  { %p465_p2 = scmp.ne.s32.totalorder %s615_s3, %s464_s22  ;;  %p468_p3 = scmp.lt.u32.totalorder %s464_s22, %s615_s3 }
  0x27   :  { %p470_p4 = pnand %p468_p3, %p465_p2 }
  0x29   :  { %473 = shalt.err (!%p470_p4)
}
  0x2a   :  { %s474_s27 = scalar_lea.vmem %s43_s10, 1024  ;;  %p479_p6 = scmp.lt.s32.totalorder %s43_s10, %s43_s10 }
  0x2b   :  { %p475_p5 = scmp.ne.s32.totalorder %s43_s10, %s474_s27  ;;  %p480_p7 = scmp.lt.s32.totalorder %s474_s27, %s474_s27 }
  0x2d   :  { %p481_p8 = por %p480_p7, %p479_p6 }
  0x2f   :  { %p482_p9 = pnand %p481_p8, %p475_p5 }
  0x31   :  { %485 = shalt.err (!%p482_p9)
}
  0x32   :  { %48 = dma.hbm_to_vmem [thread:$0]  %s615_s3, 1024, %s43_s10, [#allocation7], %s515_s28, %s515_s28, %s516_s29  }
  0x33   :  { %508 = dma.done.wait [#allocation4], 64  }
  0x34   :  { %509 = vsyncadd [#allocation4], 4294967232 }
  0x35   :  { %510 = dma.done.wait [#allocation7], 2048  }
  0x36   :  { %511 = vsyncadd [#allocation7], 4294965248  ;;  %v519_v0 = vmov 0.0   ;;  %vm520_vm0 = vmmov 0   ;;  %v404_v1 = vld [vmem:[#allocation6] sm:$0xff]   ;;  %v405_v2 = vld [vmem:[#allocation6 + $0x8] sm:$0xff]  }
  0x37   :  { %356 = vmatprep.subr.bf16.mxu0 %v519_v0  ;;  %372 = vmatprep.mubr.msk.bf16.mxu0 %vm520_vm0, %v519_v0  ;;  %v406_v3 = vld [vmem:[#allocation6 + $0x10] sm:$0xff]   ;;  %v412_v4 = vld [vmem:[#allocation8] sm:$0xff]   ;;  %v407_v5 = vld [vmem:[#allocation6 + $0x18] sm:$0xff]   ;;  %s521_s7 = smov [#allocation9]  }
  0x38   :  { %376 = vmatprep.subr.bf16.mxu1 %v519_v0  ;;  %392 = vmatprep.mubr.msk.bf16.mxu1 %vm520_vm0, %v519_v0  ;;  %v413_v6 = vld [vmem:[#allocation8 + $0x8] sm:$0xff]   ;;  %v408_v7 = vld [vmem:[#allocation6 + $0x20] sm:$0xff]   ;;  %v414_v8 = vld [vmem:[#allocation8 + $0x10] sm:$0xff]   ;;  %s310_s8 = sshll.u32 %s521_s7, 4  ;;  %s311_s8 = int_to_ptr.vmem [resolvable:$true] %s310_s8 }
  0x39   :  { %357 = vmatpush3.bf16.msra.mxu0 %v404_v1  ;;  %377 = vmatpush3.bf16.msra.mxu1 %v412_v4  ;;  %v409_v9 = vld [vmem:[#allocation6 + $0x28] sm:$0xff]   ;;  %v415_v10 = vld [vmem:[#allocation8 + $0x18] sm:$0xff]   ;;  %v410_v11 = vld [vmem:[#allocation6 + $0x30] sm:$0xff]   ;;  %p491_p11 = scmp.lt.s32.totalorder %s311_s8, %s311_s8 }
  0x3a   :  { %358 = vmatprep.subr.bf16.mxu0 %v519_v0  ;;  %378 = vmatprep.subr.bf16.mxu1 %v519_v0  ;;  %v416_v12 = vld [vmem:[#allocation8 + $0x20] sm:$0xff]   ;;  %v411_v13 = vld [vmem:[#allocation6 + $0x38] sm:$0xff]   ;;  %v417_v14 = vld [vmem:[#allocation8 + $0x28] sm:$0xff]  }
  0x3b   :  { %v61_v15 = vld [vmem:[#allocation3] sm:$0xf]  ;;  %v418_v16 = vld [vmem:[#allocation8 + $0x30] sm:$0xff]  }
  0x3c   :  { %v419_v17 = vld [vmem:[#allocation8 + $0x38] sm:$0xff]  }
  0x3d   :  { %359 = vmatpush3.bf16.msra.mxu0 %v405_v2  ;;  %379 = vmatpush3.bf16.msra.mxu1 %v413_v6  ;;  %v320_v18 = vld [vmem:[%s614_s2] ss:$0 sm:$0xff]  ;;  %s486_s2 = scalar_lea.vmem %s311_s8, 128 }
  0x3e   :  { %360 = vmatprep.subr.bf16.mxu0 %v519_v0  ;;  %380 = vmatprep.subr.bf16.mxu1 %v519_v0  ;;  %v337_v26 = vld [vmem:[%s616_s4] ss:$0 sm:$0xff]  ;;  %p487_p10 = scmp.ne.s32.totalorder %s311_s8, %s486_s2  ;;  %p492_p12 = scmp.lt.s32.totalorder %s486_s2, %s486_s2 }
  0x40   :  { %p493_p13 = por %p492_p12, %p491_p11 }
  0x41   :  { %361 = vmatpush3.bf16.msra.mxu0 %v406_v3  ;;  %381 = vmatpush3.bf16.msra.mxu1 %v414_v8 }
  0x42   :  { %362 = vmatprep.subr.bf16.mxu0 %v519_v0  ;;  %382 = vmatprep.subr.bf16.mxu1 %v519_v0  ;;  %p494_p0 = pnand %p493_p13, %p487_p10 }
  0x45   :  { %363 = vmatpush3.bf16.msra.mxu0 %v407_v5  ;;  %383 = vmatpush3.bf16.msra.mxu1 %v415_v10 }
  0x46   :  { %364 = vmatprep.subr.bf16.mxu0 %v519_v0  ;;  %384 = vmatprep.subr.bf16.mxu1 %v519_v0 }
  0x49   :  { %365 = vmatpush3.bf16.msra.mxu0 %v408_v7  ;;  %385 = vmatpush3.bf16.msra.mxu1 %v416_v12 }
  0x4a   :  { %366 = vmatprep.subr.bf16.mxu0 %v519_v0  ;;  %386 = vmatprep.subr.bf16.mxu1 %v519_v0 }
  0x4d   :  { %367 = vmatpush3.bf16.msra.mxu0 %v409_v9  ;;  %387 = vmatpush3.bf16.msra.mxu1 %v417_v14 }
  0x4e   :  { %368 = vmatprep.subr.bf16.mxu0 %v519_v0  ;;  %388 = vmatprep.subr.bf16.mxu1 %v519_v0 }
  0x51   :  { %369 = vmatpush3.bf16.msra.mxu0 %v410_v11  ;;  %389 = vmatpush3.bf16.msra.mxu1 %v418_v16 }
  0x52   :  { %370 = vmatprep.subr.bf16.mxu0 %v519_v0  ;;  %390 = vmatprep.subr.bf16.mxu1 %v519_v0 }
  0x55   :  { %371 = vmatpush3.bf16.msra.mxu0 %v411_v13  ;;  %391 = vmatpush3.bf16.msra.mxu1 %v419_v17 }
  0x58   :  { %373 = vmatmul.mubr.bf16.vlgmr.msra.gmra.mrb[0].mxu0 %v61_v15 }
 0x12b   :  { %v167_v19 = vpop.f32.mrb[0].mxu0 }
 0x12c   :  { %v168_v20 = vadd.f32 %v320_v18, %v167_v19  ;;  %v374_v21 = vpop.f32.mrb[1].mxu0 }
 0x12d   :  { %v170_v22 = vpop.f32.mrb[2].mxu0 }
 0x12e   :  { %v173_v23 = vmax.f32 %v168_v20, 0.0  ;;  %v375_v24 = vpop.f32.mrb[3].mxu0 }
 0x130   :  { %v174_v25 = vpack.c.bf16 %v173_v23, %v173_v23 }
 0x132   :  { %393 = vmatmul.mubr.bf16.vlgmr.msra.gmra.mrb[0].mxu1 %v174_v25 }
 0x205   :  { %v273_v27 = vpop.f32.mrb[0].mxu1 }
 0x206   :  { %v302_v28 = vadd.f32 %v337_v26, %v273_v27  ;;  %v394_v29 = vpop.f32.mrb[1].mxu1 }
 0x207   :  { %v276_v30 = vpop.f32.mrb[2].mxu1 }
 0x208   :  { %303 = vst [vmem:[#allocation9] sm:$0xff] %v302_v28  ;;  %v395_v31 = vpop.f32.mrb[3].mxu1 }
 0x209   :  { %497 = shalt.err (!%p494_p0)
}
 0x20a   :  { %s498_s4 = scalar_lea.hbm %s617_s5, 128 }
 0x20b   :  { %p499_p1 = scmp.ne.s32.totalorder %s617_s5, %s498_s4  ;;  %p502_p2 = scmp.lt.u32.totalorder %s498_s4, %s617_s5 }
 0x20d   :  { %p504_p3 = pnand %p502_p2, %p499_p1 }
 0x20f   :  { %507 = shalt.err (!%p504_p3)
}
 0x210   :  { %313 = dma.vmem_to_hbm [thread:$0]  %s311_s8, 128, %s617_s5, [#allocation5]  }
 0x211   :  { %512 = dma.done.wait [#allocation5], 128  }
 0x212   :  { %513 = vsyncadd [#allocation5], 4294967168 }
 0x213   :  { %317 = vsyncpa [#allocation4], 1 }
 0x214   :  { %318 = vsyncpa [#allocation7], 1 }
 0x215   :  { %319 = vsyncpa [#allocation5], 1 }

</bundles_post_ra>
